<compile_context>
chip_gen: v7x
topology: tpu7x:2x2x1
jax: 0.10.0
libtpu: 0.0.40
codegen_flags: <defaults>
</compile_context>

<pallas_src>
import jax
import jax.numpy as jnp
from jax.experimental import pallas as pl
from jax.experimental.pallas import tpu as pltpu


def _round_up(x, m):
    return ((x + m - 1) // m) * m


def _cdiv(a, b):
    return (a + b - 1) // b


def policy_net_kernel(x_ref, w1_ref, b1_ref, w2_ref, b2_ref, out_ref):
    # fc1: (tb, 9) @ (9, 128) + (1, 128) -> relu   (bf16 MXU, f32 accum)
    x = x_ref[...].astype(jnp.bfloat16)
    h = jnp.dot(x, w1_ref[...], preferred_element_type=jnp.float32)
    h = jnp.maximum(h + b1_ref[...], 0.0)
    # fc_mu: (tb, 128) @ (128, 128) -> keep only the real output columns
    # before bias/tanh/store (narrow store, tiny EUP work).
    a = jnp.dot(h.astype(jnp.bfloat16), w2_ref[...],
                preferred_element_type=jnp.float32)
    ow = out_ref.shape[-1]
    out_ref[...] = jnp.tanh(a[:, :ow] + b2_ref[...]).astype(out_ref.dtype)


def policy_net_forward(state, w1, b1, w2, b2, *, max_tb=4096):
    """state: (B, 9) f32.  Weights stored as (in_features, out_features).
    Returns (B, 2) f32 == tanh(fc_mu(relu(fc1(state))))."""
    B, F_in = state.shape
    H = w1.shape[1]          # 128
    A = w2.shape[1]          # 2
    OUT_W = 8                # narrow (but 8-wide) output slab; real cols = A
    MIN_TILE = 8

    # --- weight prep (one-time, tiny, VMEM-resident in the kernel) ---------
    w1_bf = w1.astype(jnp.bfloat16)                                    # (9,128)
    w2_pad = (jnp.zeros((H, H), jnp.float32).at[:, :A].set(w2)
              .astype(jnp.bfloat16))                                   # (128,128)
    b1_row = b1.reshape(1, H).astype(jnp.float32)                      # (1,128)
    b2_row = jnp.zeros((1, OUT_W), jnp.float32).at[0, :A].set(b2)      # (1,8)

    # --- adaptive batch tiling ---------------------------------------------
    # Pick the number of grid steps first, then the (8-aligned) tile size, so
    # padding is bounded by ~8 rows per step (no "pad up to tb" cliff).
    max_tb = max(MIN_TILE, _round_up(max_tb, MIN_TILE))
    n_steps = max(1, _cdiv(B, max_tb))
    # v7x megacore: large batches must split into >= 2 grid steps so the
    # "parallel" batch axis can shard across both TensorCores.
    if n_steps == 1 and B > 512:
        n_steps = 2
    tb = _round_up(_cdiv(B, n_steps), MIN_TILE)
    B_pad = n_steps * tb
    if B_pad != B:
        state = jnp.pad(state, ((0, B_pad - B), (0, 0)))

    grid = (n_steps,)

    out = pl.pallas_call(
        policy_net_kernel,
        out_shape=jax.ShapeDtypeStruct((B_pad, OUT_W), jnp.float32),
        grid=grid,
        in_specs=[
            pl.BlockSpec((tb, F_in), lambda i: (i, 0)),        # state tile
            pl.BlockSpec((F_in, H), lambda i: (0, 0)),         # w1 (resident)
            pl.BlockSpec((1, H), lambda i: (0, 0)),            # b1 (resident)
            pl.BlockSpec((H, H), lambda i: (0, 0)),            # w2 padded
            pl.BlockSpec((1, OUT_W), lambda i: (0, 0)),        # b2 padded
        ],
        out_specs=pl.BlockSpec((tb, OUT_W), lambda i: (i, 0)),
        compiler_params=pltpu.CompilerParams(
            dimension_semantics=("parallel",),
            vmem_limit_bytes=32 * 1024 * 1024,
        ),
    )(state, w1_bf, b1_row, w2_pad, b2_row)

    return out[:B, :A]


def init_params(key):
    """PyTorch nn.Linear-style init (U[-1/sqrt(fan_in), 1/sqrt(fan_in)]).
    Weights stored as (in_features, out_features)."""
    k1, k2, k3, k4 = jax.random.split(key, 4)
    bound1 = 1.0 / jnp.sqrt(9.0)
    bound2 = 1.0 / jnp.sqrt(128.0)
    w1 = jax.random.uniform(k1, (9, 128), jnp.float32, -bound1, bound1)
    b1 = jax.random.uniform(k2, (128,), jnp.float32, -bound1, bound1)
    w2 = jax.random.uniform(k3, (128, 2), jnp.float32, -bound2, bound2)
    b2 = jax.random.uniform(k4, (2,), jnp.float32, -bound2, bound2)
    return w1, b1, w2, b2


def _reference(state, w1, b1, w2, b2):
    return jnp.tanh(jnp.maximum(state @ w1 + b1, 0.0) @ w2 + b2)


if __name__ == "__main__":
    key = jax.random.PRNGKey(0)
    k_params, k_state1, k_state2 = jax.random.split(key, 3)

    w1, b1, w2, b2 = init_params(k_params)

    # Small-batch case (single grid step, tb collapses to 8).
    B = 8
    state = jax.random.normal(k_state1, (B, 9), jnp.float32)
    out = jax.block_until_ready(policy_net_forward(state, w1, b1, w2, b2))
    ref = _reference(state, w1, b1, w2, b2)
    assert out.shape == (B, 2)
    # bf16 matmul operands (f32 accumulation) -> loosened tolerance vs f32 ref.
    assert jnp.allclose(out, ref, atol=3e-2), float(jnp.max(jnp.abs(out - ref)))

    # Ragged batch with a forced small tile -> multi-step grid + bounded padding.
    B2 = 300
    state2 = jax.random.normal(k_state2, (B2, 9), jnp.float32)
    out2 = jax.block_until_ready(
        policy_net_forward(state2, w1, b1, w2, b2, max_tb=128))
    ref2 = _reference(state2, w1, b1, w2, b2)
    assert out2.shape == (B2, 2)
    assert jnp.allclose(out2, ref2, atol=3e-2), float(jnp.max(jnp.abs(out2 - ref2)))

    print("KERNEL_OK")
</pallas_src>

<mosaic_0001>
module attributes {stable_mosaic.version = 11 : i64} {
  func.func @policy_net_kernel(%arg0: i32, %arg1: memref<8x9xf32, #tpu.memory_space<vmem>>, %arg2: memref<9x128xbf16, #tpu.memory_space<vmem>>, %arg3: memref<1x128xf32, #tpu.memory_space<vmem>>, %arg4: memref<128x128xbf16, #tpu.memory_space<vmem>>, %arg5: memref<1x8xf32, #tpu.memory_space<vmem>>, %arg6: memref<8x8xf32, #tpu.memory_space<vmem>>) attributes {dimension_semantics = [#tpu.dimension_semantics<parallel>], iteration_bounds = array<i64: 1>, scalar_prefetch = 0 : i64, scratch_operands = 0 : i64, tpu.core_type = #tpu.core_type<tc>, window_params = [{transform_indices = @transform_0, window_bounds = array<i64: 8, 9>}, {pipeline_mode = #tpu.pipeline_mode<synchronous>, transform_indices = @transform_1, window_bounds = array<i64: 9, 128>}, {pipeline_mode = #tpu.pipeline_mode<synchronous>, transform_indices = @transform_2, window_bounds = array<i64: 1, 128>}, {pipeline_mode = #tpu.pipeline_mode<synchronous>, transform_indices = @transform_3, window_bounds = array<i64: 128, 128>}, {pipeline_mode = #tpu.pipeline_mode<synchronous>, transform_indices = @transform_4, window_bounds = array<i64: 1, 8>}, {transform_indices = @transform_5, window_bounds = array<i64: 8, 8>}]} {
    %c0 = arith.constant 0 : index
    %c0_0 = arith.constant 0 : index
    %0 = vector.load %arg1[%c0, %c0_0] : memref<8x9xf32, #tpu.memory_space<vmem>>, vector<8x9xf32>
    %1 = arith.truncf %0 : vector<8x9xf32> to vector<8x9xbf16>
    %c0_1 = arith.constant 0 : index
    %c0_2 = arith.constant 0 : index
    %2 = vector.load %arg2[%c0_1, %c0_2] : memref<9x128xbf16, #tpu.memory_space<vmem>>, vector<9x128xbf16>
    %cst = arith.constant dense<0.000000e+00> : vector<8x128xf32>
    %3 = tpu.matmul %1, %2, %cst {dimension_numbers = #tpu.dot_dimension_numbers<[1], [0], [0], [1], [0, 0, 1, 1], [], []>} : vector<8x9xbf16>, vector<9x128xbf16>, vector<8x128xf32> -> vector<8x128xf32>
    %c0_3 = arith.constant 0 : index
    %c0_4 = arith.constant 0 : index
    %4 = vector.load %arg3[%c0_3, %c0_4] : memref<1x128xf32, #tpu.memory_space<vmem>>, vector<1x128xf32>
    %5 = vector.broadcast %4 : vector<1x128xf32> to vector<8x128xf32>
    %6 = arith.addf %3, %5 : vector<8x128xf32>
    %cst_5 = arith.constant 0.000000e+00 : f32
    %7 = vector.broadcast %cst_5 : f32 to vector<8x128xf32>
    %8 = arith.maximumf %6, %7 : vector<8x128xf32>
    %9 = arith.truncf %8 : vector<8x128xf32> to vector<8x128xbf16>
    %c0_6 = arith.constant 0 : index
    %c0_7 = arith.constant 0 : index
    %10 = vector.load %arg4[%c0_6, %c0_7] : memref<128x128xbf16, #tpu.memory_space<vmem>>, vector<128x128xbf16>
    %cst_8 = arith.constant dense<0.000000e+00> : vector<8x128xf32>
    %11 = tpu.matmul %9, %10, %cst_8 {dimension_numbers = #tpu.dot_dimension_numbers<[1], [0], [0], [1], [0, 0, 1, 1], [], []>} : vector<8x128xbf16>, vector<128x128xbf16>, vector<8x128xf32> -> vector<8x128xf32>
    %12 = vector.extract_strided_slice %11 {offsets = [0, 0], sizes = [8, 8], strides = [1, 1]} : vector<8x128xf32> to vector<8x8xf32>
    %c0_9 = arith.constant 0 : index
    %c0_10 = arith.constant 0 : index
    %13 = vector.load %arg5[%c0_9, %c0_10] : memref<1x8xf32, #tpu.memory_space<vmem>>, vector<1x8xf32>
    %14 = vector.broadcast %13 : vector<1x8xf32> to vector<8x8xf32>
    %15 = arith.addf %12, %14 : vector<8x8xf32>
    %16 = math.tanh %15 : vector<8x8xf32>
    %c0_11 = arith.constant 0 : index
    %c0_12 = arith.constant 0 : index
    %17 = vector.load %arg6[%c0_11, %c0_12] : memref<8x8xf32, #tpu.memory_space<vmem>>, vector<8x8xf32>
    tpu.vector_store %arg6[%c0_11, %c0_12], %16 {strides = array<i32>} : memref<8x8xf32, #tpu.memory_space<vmem>>, vector<8x8xf32>,
    return
  }
  func.func @transform_0(%arg0: i32) -> (i32, i32) {
    %c0_i32 = arith.constant 0 : i32
    %c0_i32_0 = arith.constant 0 : i32
    return %arg0, %c0_i32 : i32, i32
  }
  func.func @transform_1(%arg0: i32) -> (i32, i32) {
    %c0_i32 = arith.constant 0 : i32
    %c0_i32_0 = arith.constant 0 : i32
    %c0_i32_1 = arith.constant 0 : i32
    return %c0_i32, %c0_i32_0 : i32, i32
  }
  func.func @transform_2(%arg0: i32) -> (i32, i32) {
    %c0_i32 = arith.constant 0 : i32
    %c0_i32_0 = arith.constant 0 : i32
    %c0_i32_1 = arith.constant 0 : i32
    return %c0_i32, %c0_i32_0 : i32, i32
  }
  func.func @transform_3(%arg0: i32) -> (i32, i32) {
    %c0_i32 = arith.constant 0 : i32
    %c0_i32_0 = arith.constant 0 : i32
    %c0_i32_1 = arith.constant 0 : i32
    return %c0_i32, %c0_i32_0 : i32, i32
  }
  func.func @transform_4(%arg0: i32) -> (i32, i32) {
    %c0_i32 = arith.constant 0 : i32
    %c0_i32_0 = arith.constant 0 : i32
    %c0_i32_1 = arith.constant 0 : i32
    return %c0_i32, %c0_i32_0 : i32, i32
  }
  func.func @transform_5(%arg0: i32) -> (i32, i32) {
    %c0_i32 = arith.constant 0 : i32
    %c0_i32_0 = arith.constant 0 : i32
    return %arg0, %c0_i32 : i32, i32
  }
}

</mosaic_0001>

<bundles_post_ra>
// kernel: tpu_custom_call.1
= control target key start
LH: loop header
LB: loop body
LE: loop exit
PB: predicated region body
PF: predicated region fallthrough
CT: control target
= control target key end

     0   :  { %10 = vsyncpa [#allocation3], 0  ;;  %s523_s0 = inlined_call_operand.hbm [shape: f32[8,9], index: 0, kind: input, shape index: {}]   ;;  %s524_s1 = inlined_call_operand.hbm [shape: bf16[9,128], index: 1, kind: input, shape index: {}]   ;;  %s525_s2 = inlined_call_operand.vmem [shape: f32[1,128], index: 2, kind: input, shape index: {}]   ;;  %s526_s3 = inlined_call_operand.hbm [shape: bf16[128,128], index: 3, kind: input, shape index: {}]   ;;  %s527_s4 = inlined_call_operand.vmem [shape: f32[1,8], index: 4, kind: input, shape index: {}]   ;;  %s528_s5 = inlined_call_operand.hbm [shape: f32[8,8], index: 5, kind: output, shape index: {}]  }
   0x1   :  { %11 = vsyncpa [#allocation6], 0 }
   0x2   :  { %12 = vsyncpa [#allocation4], 0  ;;  %s424_s18 = smov [#allocation5]   ;;  %s330_s22 = scalar_lea.hbm %s524_s1, 128 }
   0x3   :  { %s28_s19 = sshll.u32 %s424_s18, 4  ;;  %p331_p0 = scmp.ne.s32.totalorder %s524_s1, %s330_s22  ;;  %s29_s19 = int_to_ptr.vmem [resolvable:$true] %s28_s19 }
   0x4   :  { %p334_p1 = scmp.lt.u32.totalorder %s330_s22, %s524_s1 }
   0x6   :  { %p336_p2 = pnand %p334_p1, %p331_p0 }
   0x8   :  { %339 = shalt.err (!%p336_p2)
}
   0x9   :  { %s340_s27 = scalar_lea.vmem %s29_s19, 128  ;;  %p345_p4 = scmp.lt.s32.totalorder %s29_s19, %s29_s19 }
   0xa   :  { %p341_p3 = scmp.ne.s32.totalorder %s29_s19, %s340_s27  ;;  %p346_p5 = scmp.lt.s32.totalorder %s340_s27, %s340_s27 }
   0xc   :  { %p347_p6 = por %p346_p5, %p345_p4 }
   0xe   :  { %p348_p7 = pnand %p347_p6, %p341_p3 }
  0x10   :  { %351 = shalt.err (!%p348_p7)
}
  0x11   :  { %s425_s28 = smov 64   ;;  %s426_s29 = smov 4  }
  0x12   :  { %34 = dma.hbm_to_vmem [thread:$0]  %s524_s1, 128, %s29_s19, [#allocation6], %s425_s28, %s425_s28, %s426_s29  }
  0x13   :  { %s427_s7 = smov [#allocation2]   ;;  %s428_s9 = smov [#allocation7]  }
  0x14   :  { %s19_s8 = sshll.u32 %s427_s7, 4  ;;  %s42_s10 = sshll.u32 %s428_s9, 4  ;;  %s20_s8 = int_to_ptr.vmem [resolvable:$true] %s19_s8  ;;  %s43_s10 = int_to_ptr.vmem [resolvable:$true] %s42_s10 }
  0x15   :  { %s352_s13 = scalar_lea.hbm %s523_s0, 128 }
  0x16   :  { %p353_p8 = scmp.ne.s32.totalorder %s523_s0, %s352_s13  ;;  %p356_p9 = scmp.lt.u32.totalorder %s352_s13, %s523_s0 }
  0x18   :  { %p358_p10 = pnand %p356_p9, %p353_p8 }
  0x1a   :  { %361 = shalt.err (!%p358_p10)
}
  0x1b   :  { %s362_s1 = scalar_lea.vmem %s20_s8, 128  ;;  %p367_p12 = scmp.lt.s32.totalorder %s20_s8, %s20_s8 }
  0x1c   :  { %p363_p11 = scmp.ne.s32.totalorder %s20_s8, %s362_s1  ;;  %p368_p13 = scmp.lt.s32.totalorder %s362_s1, %s362_s1 }
  0x1e   :  { %p369_p0 = por %p368_p13, %p367_p12 }
  0x20   :  { %p370_p1 = pnand %p369_p0, %p363_p11 }
  0x22   :  { %373 = shalt.err (!%p370_p1)
}
  0x23   :  { %22 = dma.hbm_to_vmem [thread:$0]  %s523_s0, 128, %s20_s8, [#allocation3]  }
  0x24   :  { %s374_s22 = scalar_lea.hbm %s526_s3, 1024 }
  0x25   :  { %p375_p2 = scmp.ne.s32.totalorder %s526_s3, %s374_s22  ;;  %p378_p3 = scmp.lt.u32.totalorder %s374_s22, %s526_s3 }
  0x27   :  { %p380_p4 = pnand %p378_p3, %p375_p2 }
  0x29   :  { %383 = shalt.err (!%p380_p4)
}
  0x2a   :  { %s384_s27 = scalar_lea.vmem %s43_s10, 1024  ;;  %p389_p6 = scmp.lt.s32.totalorder %s43_s10, %s43_s10 }
  0x2b   :  { %p385_p5 = scmp.ne.s32.totalorder %s43_s10, %s384_s27  ;;  %p390_p7 = scmp.lt.s32.totalorder %s384_s27, %s384_s27 }
  0x2d   :  { %p391_p8 = por %p390_p7, %p389_p6 }
  0x2f   :  { %p392_p9 = pnand %p391_p8, %p385_p5 }
  0x31   :  { %395 = shalt.err (!%p392_p9)
}
  0x32   :  { %48 = dma.hbm_to_vmem [thread:$0]  %s526_s3, 1024, %s43_s10, [#allocation6], %s425_s28, %s425_s28, %s426_s29  }
  0x33   :  { %418 = dma.done.wait [#allocation3], 128  }
  0x34   :  { %419 = vsyncadd [#allocation3], 4294967168 }
  0x35   :  { %420 = dma.done.wait [#allocation6], 1152  }
  0x36   :  { %421 = vsyncadd [#allocation6], 4294966144  ;;  %vm81_vm0 = vcmask 1043456   ;;  %v429_v0 = vmov 0.0   ;;  %vm430_vm1 = vmmov 0   ;;  %vm82_vm2 = vcmask 1044480  }
  0x37   :  { %284 = vmatprep.subr.bf16.mxu0 %v429_v0  ;;  %290 = vmatprep.subr.bf16.mxu1 %v429_v0  ;;  %v431_v1 = vmov 65535   ;;  %v319_v4 = vld [vmem:[#allocation5] sm:$0x1f]   ;;  %v61_v5 = vld [vmem:[#allocation2] sm:$0xff]  ;;  %v320_v7 = vld [vmem:[#allocation7] sm:$0xff]   ;;  %vm77_vm3 = vcmask 72704  }
  0x38   :  { %286 = vmatprep.mubr.msk.bf16.mxu0 %vm430_vm1, %v429_v0  ;;  %306 = vmatprep.mubr.msk.bf16.mxu1 %vm430_vm1, %v429_v0  ;;  %v83_v2 = vsel %vm81_vm0, 4294967295, %v431_v1  ;;  %v62_v8 = vpack.c.bf16 %v61_v5, %v61_v5  ;;  %v321_v9 = vld [vmem:[#allocation7 + $0x8] sm:$0xff]   ;;  %v322_v10 = vld [vmem:[#allocation7 + $0x10] sm:$0xff]   ;;  %v323_v11 = vld [vmem:[#allocation7 + $0x18] sm:$0xff]   ;;  %s432_s7 = smov [#allocation8]   ;;  %vm243_vm4 = vcmask 64512  }
  0x39   :  { %v84_v3 = vsel %vm82_vm2, %v83_v2, 0  ;;  %291 = vmatpush3.bf16.msra.mxu1 %v320_v7  ;;  %v324_v12 = vld [vmem:[#allocation7 + $0x20] sm:$0xff]   ;;  %v325_v13 = vld [vmem:[#allocation7 + $0x28] sm:$0xff]   ;;  %v326_v14 = vld [vmem:[#allocation7 + $0x30] sm:$0xff]  }
  0x3a   :  { %v86_v6 = vand.u32 %v319_v4, %v84_v3  ;;  %292 = vmatprep.subr.bf16.mxu1 %v429_v0  ;;  %v327_v15 = vld [vmem:[#allocation7 + $0x38] sm:$0xff]   ;;  %v261_v16 = vld [vmem:[%s525_s2] ss:$0 sm:$0xff]  ;;  %s251_s2 = sshll.u32 %s432_s7, 4  ;;  %s252_s2 = int_to_ptr.vmem [resolvable:$true] %s251_s2 }
  0x3b   :  { %v272_v24 = vld [vmem:[%s527_s4] ss:$0 sm:$0xff]  ;;  %s396_s8 = scalar_lea.vmem %s252_s2, 128  ;;  %p401_p11 = scmp.lt.s32.totalorder %s252_s2, %s252_s2 }
  0x3c   :  { %285 = vmatpush3.bf16.msra.mxu0 %v86_v6  ;;  %p397_p10 = scmp.ne.s32.totalorder %s252_s2, %s396_s8  ;;  %p402_p12 = scmp.lt.s32.totalorder %s396_s8, %s396_s8 }
  0x3d   :  { %293 = vmatpush3.bf16.msra.mxu1 %v321_v9 }
  0x3e   :  { %294 = vmatprep.subr.bf16.mxu1 %v429_v0  ;;  %p403_p13 = por %p402_p12, %p401_p11 }
  0x3f   :  { %287 = vmatmul.mubr.msk.bf16.vlgmr.msra.gmra.mrb[0].mxu0 %vm77_vm3, %v62_v8 }
  0x40   :  { %p404_p0 = pnand %p403_p13, %p397_p10 }
  0x41   :  { %295 = vmatpush3.bf16.msra.mxu1 %v322_v10 }
  0x42   :  { %296 = vmatprep.subr.bf16.mxu1 %v429_v0 }
  0x45   :  { %297 = vmatpush3.bf16.msra.mxu1 %v323_v11 }
  0x46   :  { %298 = vmatprep.subr.bf16.mxu1 %v429_v0 }
  0x49   :  { %299 = vmatpush3.bf16.msra.mxu1 %v324_v12 }
  0x4a   :  { %300 = vmatprep.subr.bf16.mxu1 %v429_v0 }
  0x4d   :  { %301 = vmatpush3.bf16.msra.mxu1 %v325_v13 }
  0x4e   :  { %302 = vmatprep.subr.bf16.mxu1 %v429_v0 }
  0x51   :  { %303 = vmatpush3.bf16.msra.mxu1 %v326_v14 }
  0x52   :  { %304 = vmatprep.subr.bf16.mxu1 %v429_v0 }
  0x55   :  { %305 = vmatpush3.bf16.msra.mxu1 %v327_v15 }
 0x112   :  { %v122_v17 = vpop.f32.mrb[0].mxu0 }
 0x113   :  { %v123_v18 = vadd.f32 %v261_v16, %v122_v17  ;;  %v288_v19 = vpop.f32.mrb[1].mxu0 }
 0x114   :  { %v125_v20 = vpop.f32.mrb[2].mxu0 }
 0x115   :  { %v128_v21 = vmax.f32 %v123_v18, 0.0  ;;  %v289_v22 = vpop.f32.mrb[3].mxu0 }
 0x117   :  { %v129_v23 = vpack.c.bf16 %v128_v21, %v128_v21 }
 0x119   :  { %307 = vmatmul.mubr.bf16.vlgmr.msra.gmra.mrb[0].mxu1 %v129_v23 }
 0x1ec   :  { %v228_v25 = vpop.f32.mrb[0].mxu1 }
 0x1ed   :  { %v241_v26 = vadd.f32 %v272_v24, %v228_v25  ;;  %v308_v27 = vpop.f32.mrb[1].mxu1 }
 0x1ee   :  { %v231_v28 = vpop.f32.mrb[2].mxu1 }
 0x1ef   :  { %328 = vtanh.f32 %v241_v26  ;;  %v309_v29 = vpop.f32.mrb[3].mxu1 }
 0x1f9   :  { %v329_v30 = vpop.eup %328 }
 0x1fa   :  { %244 = vst.msk [vmem:[#allocation8] sm:$0xff] %vm243_vm4, %v329_v30 }
 0x1fb   :  { %407 = shalt.err (!%p404_p0)
}
 0x1fc   :  { %s408_s10 = scalar_lea.hbm %s528_s5, 128 }
 0x1fd   :  { %p409_p1 = scmp.ne.s32.totalorder %s528_s5, %s408_s10  ;;  %p412_p2 = scmp.lt.u32.totalorder %s408_s10, %s528_s5 }
 0x1ff   :  { %p414_p3 = pnand %p412_p2, %p409_p1 }
 0x201   :  { %417 = shalt.err (!%p414_p3)
}
 0x202   :  { %254 = dma.vmem_to_hbm [thread:$0]  %s252_s2, 128, %s528_s5, [#allocation4]  }
 0x203   :  { %422 = dma.done.wait [#allocation4], 128  }
 0x204   :  { %423 = vsyncadd [#allocation4], 4294967168 }
 0x205   :  { %258 = vsyncpa [#allocation3], 1 }
 0x206   :  { %259 = vsyncpa [#allocation6], 1 }
 0x207   :  { %260 = vsyncpa [#allocation4], 1 }

</bundles_post_ra>
